<compile_context>
chip_gen: v6e
topology: v6e:2x2x1
jax: 0.10.0
libtpu: 0.0.40
codegen_flags: <defaults>
</compile_context>

<pallas_src>
import math
import numpy as np
import jax
import jax.numpy as jnp
from jax.experimental import pallas as pl
from jax.experimental.pallas import tpu as pltpu


# ----------------------------- configuration -----------------------------
BODY_LENS = 4          # number of body parts
JOINT_NUM = 8          # number of joints
IN_CHANNELS = 128      # first_layer => in_channels % joint_num == 0
OUT_CHANNELS = 128     # out_channels % body_lens == 0
FIRST_LAYER = True
LAST_LAYER = False
BATCH = 2
SEQ = 16
MAX_TILE_M = 512       # only tile the row axis if batch*seq exceeds this


# ------------------- mask construction (mirrors __init__) ----------------
def build_bodypart_mask(body_lens, masks, in_channels, out_channels, joint_num,
                        first_layer, last_layer):
    """Replicates BodyPartMlp.__init__ mask construction in numpy."""
    in_per_part = in_channels // body_lens
    out_per_part = out_channels // body_lens

    if first_layer and (in_channels % joint_num != 0 or out_channels % body_lens != 0):
        raise Exception("BAD")
    if last_layer and (in_channels % body_lens != 0 or out_channels % joint_num != 0):
        raise Exception("BAD")
    if (not first_layer) and (not last_layer) and (
            in_channels % body_lens != 0 or out_channels % body_lens != 0):
        raise Exception("BAD")

    in_neighbour_list = []
    if not first_layer:
        for i in range(body_lens):
            in_neighbour_list.append(list(range(i * in_per_part, (i + 1) * in_per_part)))
    else:
        per_joint = in_channels // joint_num
        for i in range(masks.shape[0]):
            index = np.where(masks[i] == 1)[0]
            expanded = []
            for k in index:
                for j in range(per_joint):
                    expanded.append(int(k) * per_joint + j)
            in_neighbour_list.append(expanded)

    out_neighbour_list = []
    if not last_layer:
        for i in range(body_lens):
            out_neighbour_list.append(list(range(i * out_per_part, (i + 1) * out_per_part)))
    else:
        per_joint = out_channels // joint_num
        for i in range(body_lens):
            index = np.where(masks[i] == 1)[0]
            expanded = []
            for k in index:
                for j in range(per_joint):
                    expanded.append(int(k) * per_joint + j)
            out_neighbour_list.append(expanded)

    mask = np.zeros((out_channels, in_channels), dtype=np.float32)
    for i in range(body_lens):
        for j in out_neighbour_list[i]:
            mask[j, in_neighbour_list[i]] = 1.0

    if last_layer:
        covered = set()
        for lst in out_neighbour_list:
            covered.update(lst)
        for k in range(out_channels):
            if k not in covered:
                mask[k, :] = 1.0
    return mask


# ------------------------------ Pallas kernel -----------------------------
def _masked_linear_kernel(x_ref, w_ref, b_ref, o_ref):
    # w_ref is (weight * mask).T, pre-folded + pre-transposed at build time
    # (mask is a constant non-trainable parameter, so this is equivalent to the
    #  module's per-forward `weight * mask`). HIGHEST precision keeps full f32
    #  MXU accuracy (the problem is launch-bound, not compute-bound).
    y = jnp.dot(x_ref[...], w_ref[...],
                preferred_element_type=jnp.float32,
                precision=jax.lax.Precision.HIGHEST)
    o_ref[...] = y + b_ref[...]


def bodypart_mlp_forward(x, w_masked_t, bias_row, *, max_tile_m=MAX_TILE_M):
    """x: (..., Cin) -> (..., Cout).  Single fused pallas_call."""
    cin, cout = w_masked_t.shape
    lead = x.shape[:-1]
    x2 = x.reshape(-1, cin)
    m = x2.shape[0]

    # One grid step when the whole token axis fits a single tile (shipped config:
    # m=32 -> tile_m=32, grid=1, no padding). Row-tile only for large m.
    tile_m = min(((m + 7) // 8) * 8, max_tile_m)
    m_blocks = pl.cdiv(m, tile_m)
    m_pad = m_blocks * tile_m
    padded = m_pad != m
    if padded:
        x2 = jnp.pad(x2, ((0, m_pad - m), (0, 0)))

    cost = pl.CostEstimate(
        flops=2 * m_pad * cin * cout,
        transcendentals=0,
        bytes_accessed=4 * (m_pad * cin + cin * cout + cout + m_pad * cout))

    # Don't split tiny problems across v7x's two TensorCores; only mark the row
    # grid parallel when each TC actually gets substantial tiles.
    semantics = ("parallel",) if (m_blocks > 1 and tile_m >= 256) else ("arbitrary",)

    out = pl.pallas_call(
        _masked_linear_kernel,
        out_shape=jax.ShapeDtypeStruct((m_pad, cout), jnp.float32),
        grid=(m_blocks,),
        in_specs=[
            pl.BlockSpec((tile_m, cin), lambda i: (i, 0)),
            pl.BlockSpec((cin, cout), lambda i: (0, 0)),   # weight stays VMEM-resident
            pl.BlockSpec((1, cout), lambda i: (0, 0)),
        ],
        out_specs=pl.BlockSpec((tile_m, cout), lambda i: (i, 0)),
        compiler_params=pltpu.CompilerParams(dimension_semantics=semantics),
        cost_estimate=cost,
    )(x2, w_masked_t, bias_row)

    if padded:
        out = out[:m]
    return out.reshape(*lead, cout)


# --------------------------- parameter building ---------------------------
def build_params(key):
    kw, kb = jax.random.split(key)

    # joint->part correspondence masks: part i owns joints {2i, 2i+1}
    joint_masks = np.zeros((BODY_LENS, JOINT_NUM), dtype=np.float32)
    for i in range(BODY_LENS):
        joint_masks[i, 2 * i] = 1.0
        joint_masks[i, 2 * i + 1] = 1.0

    mask = build_bodypart_mask(BODY_LENS, joint_masks, IN_CHANNELS, OUT_CHANNELS,
                               JOINT_NUM, FIRST_LAYER, LAST_LAYER)

    # kaiming_uniform_(a=sqrt(5)) on (Cout, Cin)  ==  U(-1/sqrt(fan_in), 1/sqrt(fan_in))
    fan_in = IN_CHANNELS
    bound = 1.0 / math.sqrt(fan_in)
    weight = jax.random.uniform(kw, (OUT_CHANNELS, IN_CHANNELS), jnp.float32,
                                minval=-bound, maxval=bound)
    bias = jax.random.uniform(kb, (OUT_CHANNELS,), jnp.float32,
                              minval=-bound, maxval=bound)

    mask_j = jnp.asarray(mask)
    # Pre-fold mask and pre-transpose once (hoisted out of the per-call path).
    w_masked_t = (weight * mask_j).T            # (Cin, Cout)
    bias_row = bias.reshape(1, OUT_CHANNELS)    # (1, Cout) lane-dense bias
    return {
        "weight": weight, "mask": mask_j, "bias": bias,
        "w_masked_t": w_masked_t, "bias_row": bias_row,
    }


# --------------------------------- main -----------------------------------
if __name__ == "__main__":
    key = jax.random.PRNGKey(0)
    pkey, xkey = jax.random.split(key)
    params = build_params(pkey)

    x = jax.random.normal(xkey, (BATCH, SEQ, IN_CHANNELS), dtype=jnp.float32)

    out = bodypart_mlp_forward(x, params["w_masked_t"], params["bias_row"])
    out = jax.block_until_ready(out)

    # Reference (numpy, matches the PyTorch forward: x @ (W*M)^T + b)
    w_np = np.asarray(params["weight"])
    m_np = np.asarray(params["mask"])
    b_np = np.asarray(params["bias"])
    x_np = np.asarray(x).reshape(-1, IN_CHANNELS)
    ref = (x_np @ (w_np * m_np).T + b_np).reshape(BATCH, SEQ, OUT_CHANNELS)

    assert out.shape == (BATCH, SEQ, OUT_CHANNELS), out.shape
    assert bool(jnp.all(jnp.isfinite(out)))
    # Tight tolerance: f32 MXU path (precision=HIGHEST) must match numpy f32.
    np.testing.assert_allclose(np.asarray(out), ref, rtol=1e-5, atol=1e-5)
    print("KERNEL_OK")
</pallas_src>

<mosaic_0001>
module attributes {stable_mosaic.version = 11 : i64} {
  func.func @_masked_linear_kernel(%arg0: i32, %arg1: memref<32x128xf32, #tpu.memory_space<vmem>>, %arg2: memref<128x128xf32, #tpu.memory_space<vmem>>, %arg3: memref<1x128xf32, #tpu.memory_space<vmem>>, %arg4: memref<32x128xf32, #tpu.memory_space<vmem>>) attributes {dimension_semantics = [#tpu.dimension_semantics<arbitrary>], iteration_bounds = array<i64: 1>, scalar_prefetch = 0 : i64, scratch_operands = 0 : i64, tpu.core_type = #tpu.core_type<tc>, window_params = [{transform_indices = @transform_0, window_bounds = array<i64: 32, 128>}, {pipeline_mode = #tpu.pipeline_mode<synchronous>, transform_indices = @transform_1, window_bounds = array<i64: 128, 128>}, {pipeline_mode = #tpu.pipeline_mode<synchronous>, transform_indices = @transform_2, window_bounds = array<i64: 1, 128>}, {transform_indices = @transform_3, window_bounds = array<i64: 32, 128>}]} {
    %c0 = arith.constant 0 : index
    %c0_0 = arith.constant 0 : index
    %0 = vector.load %arg1[%c0, %c0_0] : memref<32x128xf32, #tpu.memory_space<vmem>>, vector<32x128xf32>
    %c0_1 = arith.constant 0 : index
    %c0_2 = arith.constant 0 : index
    %1 = vector.load %arg2[%c0_1, %c0_2] : memref<128x128xf32, #tpu.memory_space<vmem>>, vector<128x128xf32>
    %cst = arith.constant dense<0.000000e+00> : vector<32x128xf32>
    %2 = tpu.matmul %0, %1, %cst {dimension_numbers = #tpu.dot_dimension_numbers<[1], [0], [0], [1], [0, 0, 1, 1], [], []>, precision = #tpu.contract_precision<fp32>} : vector<32x128xf32>, vector<128x128xf32>, vector<32x128xf32> -> vector<32x128xf32>
    %c0_3 = arith.constant 0 : index
    %c0_4 = arith.constant 0 : index
    %3 = vector.load %arg3[%c0_3, %c0_4] : memref<1x128xf32, #tpu.memory_space<vmem>>, vector<1x128xf32>
    %4 = vector.broadcast %3 : vector<1x128xf32> to vector<32x128xf32>
    %5 = arith.addf %2, %4 : vector<32x128xf32>
    %c0_5 = arith.constant 0 : index
    %c0_6 = arith.constant 0 : index
    %6 = vector.load %arg4[%c0_5, %c0_6] : memref<32x128xf32, #tpu.memory_space<vmem>>, vector<32x128xf32>
    tpu.vector_store %arg4[%c0_5, %c0_6], %5 {strides = array<i32>} : memref<32x128xf32, #tpu.memory_space<vmem>>, vector<32x128xf32>,
    return
  }
  func.func @transform_0(%arg0: i32) -> (i32, i32) {
    %c0_i32 = arith.constant 0 : i32
    %c0_i32_0 = arith.constant 0 : i32
    return %arg0, %c0_i32 : i32, i32
  }
  func.func @transform_1(%arg0: i32) -> (i32, i32) {
    %c0_i32 = arith.constant 0 : i32
    %c0_i32_0 = arith.constant 0 : i32
    %c0_i32_1 = arith.constant 0 : i32
    return %c0_i32, %c0_i32_0 : i32, i32
  }
  func.func @transform_2(%arg0: i32) -> (i32, i32) {
    %c0_i32 = arith.constant 0 : i32
    %c0_i32_0 = arith.constant 0 : i32
    %c0_i32_1 = arith.constant 0 : i32
    return %c0_i32, %c0_i32_0 : i32, i32
  }
  func.func @transform_3(%arg0: i32) -> (i32, i32) {
    %c0_i32 = arith.constant 0 : i32
    %c0_i32_0 = arith.constant 0 : i32
    return %arg0, %c0_i32 : i32, i32
  }
}

</mosaic_0001>

<bundles_post_ra>
// kernel: tpu_custom_call.1
= control target key start
LH: loop header
LB: loop body
LE: loop exit
PB: predicated region body
PF: predicated region fallthrough
CT: control target
= control target key end

     0   :  { %8 = vsyncpa [#allocation3], 0  ;;  %s1708_s0 = inlined_call_operand.hbm [shape: f32[32,128], index: 0, kind: input, shape index: {}]   ;;  %s1709_s1 = inlined_call_operand.hbm [shape: f32[128,128], index: 1, kind: input, shape index: {}]   ;;  %s1710_s2 = inlined_call_operand.vmem [shape: f32[1,128], index: 2, kind: input, shape index: {}]   ;;  %s1711_s3 = inlined_call_operand.hbm [shape: f32[32,128], index: 3, kind: output, shape index: {}]  }
   0x1   :  { %9 = vsyncpa [#allocation6], 0 }
   0x2   :  { %10 = vsyncpa [#allocation4], 0  ;;  %s1282_s12 = smov [#allocation2]  }
   0x3   :  { %s16_s13 = sshll.u32 %s1282_s12, 4  ;;  %s17_s13 = int_to_ptr.vmem [resolvable:$true] %s16_s13 }
   0x4   :  { %s1224_s14 = scalar_lea.vmem %s17_s13, 512  ;;  %p1229_p1 = scmp.lt.s32.totalorder %s17_s13, %s17_s13 }
   0x5   :  { %p1225_p0 = scmp.ne.s32.totalorder %s17_s13, %s1224_s14  ;;  %p1230_p2 = scmp.lt.s32.totalorder %s1224_s14, %s1224_s14 }
   0x7   :  { %p1231_p3 = por %p1230_p2, %p1229_p1 }
   0x9   :  { %p1232_p4 = pnand %p1231_p3, %p1225_p0 }
   0xb   :  { %1235 = shalt.err (!%p1232_p4)
}
   0xc   :  { %s1283_s15 = smov 128   ;;  %s1284_s16 = smov 8  }
   0xd   :  { %22 = dma.hbm_to_vmem [thread:$0]  %s1708_s0, 512, %s17_s13, [#allocation3], %s1283_s15, %s1283_s15, %s1284_s16  }
   0xe   :  { %s1285_s19 = smov [#allocation5]  }
   0xf   :  { %s28_s20 = sshll.u32 %s1285_s19, 4  ;;  %s29_s20 = int_to_ptr.vmem [resolvable:$true] %s28_s20 }
  0x10   :  { %s1244_s21 = scalar_lea.vmem %s29_s20, 2048  ;;  %p1249_p6 = scmp.lt.s32.totalorder %s29_s20, %s29_s20 }
  0x11   :  { %p1245_p5 = scmp.ne.s32.totalorder %s29_s20, %s1244_s21  ;;  %p1250_p7 = scmp.lt.s32.totalorder %s1244_s21, %s1244_s21 }
  0x13   :  { %p1251_p8 = por %p1250_p7, %p1249_p6 }
  0x15   :  { %p1252_p9 = pnand %p1251_p8, %p1245_p5 }
  0x17   :  { %1255 = shalt.err (!%p1252_p9)
}
  0x18   :  { %34 = dma.hbm_to_vmem [thread:$0]  %s1709_s1, 2048, %s29_s20, [#allocation6], %s1283_s15, %s1283_s15, %s1284_s16  }
  0x19   :  { %1276 = dma.done.wait [#allocation3], 512  }
  0x1a   :  { %1277 = vsyncadd [#allocation3], 4294966784 }
  0x1b   :  { %1278 = dma.done.wait [#allocation6], 2048  }
  0x1c   :  { %1279 = vsyncadd [#allocation6], 4294965248  ;;  %v62_v0 = vld [vmem:[#allocation5 + $0x78] sm:$0xff]  ;;  %v61_v1 = vld [vmem:[#allocation5 + $0x70] sm:$0xff] }
  0x1d   :  { %v60_v2 = vld [vmem:[#allocation5 + $0x68] sm:$0xff]  ;;  %v1319_v3 = vand.u32 4294901760, %v62_v0  ;;  %v1321_v4 = vand.u32 4294901760, %v61_v1  ;;  %v59_v6 = vld [vmem:[#allocation5 + $0x60] sm:$0xff]  ;;  %v58_v7 = vld [vmem:[#allocation5 + $0x58] sm:$0xff] }
  0x1e   :  { %v1323_v5 = vand.u32 4294901760, %v60_v2  ;;  %v57_v8 = vld [vmem:[#allocation5 + $0x50] sm:$0xff]  ;;  %v1325_v9 = vand.u32 4294901760, %v59_v6  ;;  %v1327_v10 = vand.u32 4294901760, %v58_v7  ;;  %v56_v12 = vld [vmem:[#allocation5 + $0x48] sm:$0xff]  ;;  %v55_v13 = vld [vmem:[#allocation5 + $0x40] sm:$0xff] }
  0x1f   :  { %v1329_v11 = vand.u32 4294901760, %v57_v8  ;;  %983 = vmatprep.subr.mxu0 %v1319_v3  ;;  %v1333_v14 = vsub.f32 %v62_v0, %v1319_v3  ;;  %v1336_v15 = vsub.f32 %v61_v1, %v1321_v4  ;;  %v1338_v16 = vand.u32 4294901760, %v56_v12  ;;  %v54_v18 = vld [vmem:[#allocation5 + $0x38] sm:$0xff]  ;;  %v53_v25 = vld [vmem:[#allocation5 + $0x30] sm:$0xff]  ;;  %v52_v35 = vld [vmem:[#allocation5 + $0x28] sm:$0xff] }
  0x20   :  { %v1341_v17 = vsub.f32 %v60_v2, %v1323_v5  ;;  %984 = vmatpush3.msra.mxu0 %v1319_v3  ;;  %v1345_v19 = vsub.f32 %v59_v6, %v1325_v9  ;;  %v1348_v20 = vsub.f32 %v58_v7, %v1327_v10  ;;  %v1360_v24 = vand.u32 4294901760, %v55_v13  ;;  %v51_v40 = vld [vmem:[#allocation5 + $0x20] sm:$0xff]  ;;  %v50_v48 = vld [vmem:[#allocation5 + $0x18] sm:$0xff]  ;;  %v44_v54 = vld [vmem:[#allocation2 + $0x8] sm:$0xff] }
  0x21   :  { %985 = vmatprep.subr.mxu0 %v1321_v4  ;;  %v1352_v21 = vand.u32 4294901760, %v1333_v14  ;;  %v1355_v22 = vand.u32 4294901760, %v1336_v15  ;;  %v1366_v27 = vand.u32 4294901760, %v54_v18  ;;  %v1372_v29 = vsub.f32 %v57_v8, %v1329_v11  ;;  %v43_v49 = vld [vmem:[#allocation2] sm:$0xff]  ;;  %v49_v59 = vld [vmem:[#allocation5 + $0x10] sm:$0xff]  ;;  %v48_v2 = vld [vmem:[#allocation5 + $0x8] sm:$0xff] }
  0x22   :  { %v1358_v23 = vand.u32 4294901760, %v1341_v17  ;;  %986 = vmatpush3.msra.mxu0 %v1321_v4  ;;  %v1364_v26 = vand.u32 4294901760, %v1345_v19  ;;  %v1369_v28 = vand.u32 4294901760, %v1348_v20  ;;  %v1382_v33 = vsub.f32 %v56_v12, %v1338_v16 }
  0x23   :  { %987 = vmatprep.subr.mxu0 %v1323_v5  ;;  %v195_v30 = vsub.f32 %v1333_v14, %v1352_v21  ;;  %v202_v31 = vsub.f32 %v1336_v15, %v1355_v22  ;;  %v1385_v34 = vand.u32 4294901760, %v53_v25  ;;  %v1391_v39 = vand.u32 4294901760, %v1372_v29 }
  0x24   :  { %v209_v32 = vsub.f32 %v1341_v17, %v1358_v23  ;;  %988 = vmatpush3.msra.mxu0 %v1323_v5  ;;  %v216_v38 = vsub.f32 %v1345_v19, %v1364_v26  ;;  %v223_v41 = vsub.f32 %v1348_v20, %v1369_v28  ;;  %v1397_v42 = vand.u32 4294901760, %v1382_v33 }
  0x25   :  { %989 = vmatprep.subr.mxu0 %v1325_v9  ;;  %v196_v36 = vand.u32 4294901760, %v195_v30  ;;  %v203_v37 = vand.u32 4294901760, %v202_v31  ;;  %v1400_v43 = vsub.f32 %v55_v13, %v1360_v24  ;;  %v1403_v45 = vand.u32 4294901760, %v52_v35 }
  0x26   :  { %990 = vmatpush3.msra.mxu0 %v1325_v9  ;;  %v210_v44 = vand.u32 4294901760, %v209_v32  ;;  %v1406_v46 = vsub.f32 %v54_v18, %v1366_v27  ;;  %v1409_v47 = vand.u32 4294901760, %v51_v40  ;;  %v217_v50 = vand.u32 4294901760, %v216_v38  ;;  %v47_v18 = vld [vmem:[#allocation5] sm:$0xff] }
  0x27   :  { %991 = vmatprep.subr.mxu0 %v1327_v10  ;;  %1021 = vmatprep.subr.mxu1 %v196_v36  ;;  %v230_v51 = vsub.f32 %v1372_v29, %v1391_v39  ;;  %v1415_v52 = vand.u32 4294901760, %v1400_v43  ;;  %v1418_v53 = vsub.f32 %v53_v25, %v1385_v34  ;;  %v224_v55 = vand.u32 4294901760, %v223_v41 }
  0x28   :  { %992 = vmatpush3.msra.mxu0 %v1327_v10  ;;  %1022 = vmatpush3.msra.mxu1 %v196_v36  ;;  %v237_v56 = vsub.f32 %v1382_v33, %v1397_v42  ;;  %v1424_v57 = vand.u32 4294901760, %v50_v48  ;;  %v1427_v58 = vand.u32 4294901760, %v1406_v46  ;;  %v1430_v60 = vsub.f32 %v52_v35, %v1403_v45 }
  0x29   :  { %993 = vmatprep.subr.mxu0 %v1329_v11  ;;  %1023 = vmatprep.subr.mxu1 %v203_v37  ;;  %v1432_v61 = vand.u32 4294901760, %v43_v49  ;;  %v1435_v62 = vand.u32 4294901760, %v44_v54  ;;  %v231_v63 = vand.u32 4294901760, %v230_v51  ;;  %v244_v0 = vsub.f32 %v1400_v43, %v1415_v52 }
  0x2a   :  { %994 = vmatpush3.msra.mxu0 %v1329_v11  ;;  %1024 = vmatpush3.msra.mxu1 %v203_v37  ;;  %v1441_v1 = vand.u32 4294901760, %v1418_v53  ;;  %v1444_v6 = vsub.f32 %v51_v40, %v1409_v47  ;;  %v238_v7 = vand.u32 4294901760, %v237_v56  ;;  %v1447_v8 = vand.u32 4294901760, %v49_v59 }
  0x2b   :  { %995 = vmatprep.subr.mxu0 %v1338_v16  ;;  %1025 = vmatprep.subr.mxu1 %v210_v44  ;;  %v251_v12 = vsub.f32 %v1406_v46, %v1427_v58  ;;  %v1453_v13 = vand.u32 4294901760, %v1430_v60  ;;  %v1456_v25 = vsub.f32 %v43_v49, %v1432_v61  ;;  %v1459_v30 = vsub.f32 %v50_v48, %v1424_v57 }
  0x2c   :  { %996 = vmatpush3.msra.mxu0 %v1338_v16  ;;  %1026 = vmatpush3.msra.mxu1 %v210_v44  ;;  %v1462_v31 = vand.u32 4294901760, %v48_v2  ;;  %v1465_v32 = vsub.f32 %v44_v54, %v1435_v62  ;;  %v245_v35 = vand.u32 4294901760, %v244_v0  ;;  %v258_v36 = vsub.f32 %v1418_v53, %v1441_v1 }
  0x2d   :  { %997 = vmatprep.subr.mxu0 %v1360_v24  ;;  %1027 = vmatprep.subr.mxu1 %v217_v50  ;;  %v1471_v37 = vand.u32 4294901760, %v1444_v6  ;;  %v1474_v38 = vand.u32 4294901760, %v47_v18  ;;  %v1477_v40 = vsub.f32 %v49_v59, %v1447_v8  ;;  %v252_v41 = vand.u32 4294901760, %v251_v12 }
  0x2e   :  { %998 = vmatpush3.msra.mxu0 %v1360_v24  ;;  %1028 = vmatpush3.msra.mxu1 %v217_v50  ;;  %v265_v44 = vsub.f32 %v1430_v60, %v1453_v13  ;;  %v1713_v48 = vand.u32 4294901760, %v1456_v25  ;;  %v1484_v49 = vand.u32 4294901760, %v1459_v30  ;;  %v1712_v50 = vand.u32 4294901760, %v1465_v32 }
  0x2f   :  { %999 = vmatprep.subr.mxu0 %v1366_v27  ;;  %1029 = vmatprep.subr.mxu1 %v224_v55  ;;  %v1489_v51 = vsub.f32 %v48_v2, %v1462_v31  ;;  %v259_v54 = vand.u32 4294901760, %v258_v36  ;;  %v1496_v56 = vand.u32 4294901760, %v1477_v40  ;;  %v1499_v59 = vsub.f32 %v47_v18, %v1474_v38 }
  0x30   :  { %1000 = vmatpush3.msra.mxu0 %v1366_v27  ;;  %1030 = vmatpush3.msra.mxu1 %v224_v55  ;;  %v272_v55 = vsub.f32 %v1444_v6, %v1471_v37  ;;  %v154_v0 = vsub.f32 %v1456_v25, %v1713_v48  ;;  %v279_v2 = vsub.f32 %v1459_v30, %v1484_v49 }
  0x31   :  { %1001 = vmatprep.subr.mxu0 %v1385_v34  ;;  %1031 = vmatprep.subr.mxu1 %v231_v63  ;;  %v1512_v12 = vand.u32 4294901760, %v1489_v51  ;;  %v1519_v36 = vand.u32 4294901760, %v1499_v59 }
  0x32   :  { %1002 = vmatpush3.msra.mxu0 %v1385_v34  ;;  %1032 = vmatpush3.msra.mxu1 %v231_v63  ;;  %v266_v63 = vand.u32 4294901760, %v265_v44  ;;  %v273_v18 = vand.u32 4294901760, %v272_v55  ;;  %v280_v44 = vand.u32 4294901760, %v279_v2  ;;  %v45_v2 = vld [vmem:[#allocation2 + $0x10] sm:$0xff] }
  0x33   :  { %1003 = vmatprep.subr.mxu0 %v1403_v45  ;;  %1033 = vmatprep.subr.mxu1 %v238_v7  ;;  %v293_v55 = vsub.f32 %v1489_v51, %v1512_v12  ;;  %v300_v48 = vsub.f32 %v1499_v59, %v1519_v36 }
  0x34   :  { %1004 = vmatpush3.msra.mxu0 %v1403_v45  ;;  %1034 = vmatpush3.msra.mxu1 %v238_v7  ;;  %v164_v7 = vsub.f32 %v1465_v32, %v1712_v50 }
  0x35   :  { %1005 = vmatprep.subr.mxu0 %v1409_v47  ;;  %1035 = vmatprep.subr.mxu1 %v245_v35 }
  0x36   :  { %1006 = vmatpush3.msra.mxu0 %v1409_v47  ;;  %1036 = vmatpush3.msra.mxu1 %v245_v35  ;;  %v286_v35 = vsub.f32 %v1477_v40, %v1496_v56  ;;  %v165_v50 = vand.u32 4294901760, %v164_v7 }
  0x37   :  { %1007 = vmatprep.subr.mxu0 %v1424_v57  ;;  %1037 = vmatprep.subr.mxu1 %v252_v41 }
  0x38   :  { %1008 = vmatpush3.msra.mxu0 %v1424_v57  ;;  %1038 = vmatpush3.msra.mxu1 %v252_v41  ;;  %v155_v41 = vand.u32 4294901760, %v154_v0  ;;  %v301_v0 = vand.u32 4294901760, %v300_v48 }
  0x39   :  { %1009 = vmatprep.subr.mxu0 %v1447_v8  ;;  %1039 = vmatprep.subr.mxu1 %v259_v54 }
  0x3a   :  { %1010 = vmatpush3.msra.mxu0 %v1447_v8  ;;  %1040 = vmatpush3.msra.mxu1 %v259_v54  ;;  %v287_v54 = vand.u32 4294901760, %v286_v35 }
  0x3b   :  { %1011 = vmatprep.subr.mxu0 %v1462_v31  ;;  %1041 = vmatprep.subr.mxu1 %v266_v63 }
  0x3c   :  { %1012 = vmatpush3.msra.mxu0 %v1462_v31  ;;  %1042 = vmatpush3.msra.mxu1 %v266_v63  ;;  %v294_v63 = vand.u32 4294901760, %v293_v55 }
  0x3d   :  { %1013 = vmatprep.subr.mxu0 %v1474_v38  ;;  %1043 = vmatprep.subr.mxu1 %v273_v18 }
  0x3e   :  { %1014 = vmatpush3.msra.mxu0 %v1474_v38  ;;  %1044 = vmatpush3.msra.mxu1 %v273_v18 }
  0x3f   :  { %1015 = vmatprep.mubr.f32.mxu0 %v155_v41  ;;  %1045 = vmatprep.subr.mxu1 %v280_v44 }
  0x40   :  { %1059 = vmatprep.subr.mxu0 %v1333_v14  ;;  %1016 = vmatmul.mubr.f32.vlgmr.msra.gmra.mxu0 %v165_v50  ;;  %v46_v50 = vld [vmem:[#allocation2 + $0x18] sm:$0xff] }
  0x41   :  { %1046 = vmatpush3.msra.mxu1 %v280_v44  ;;  %1060 = vmatpush3.msra.mxu0 %v1333_v14  ;;  %v1539_v14 = vand.u32 4294901760, %v45_v2 }
  0x42   :  { %1047 = vmatprep.subr.mxu1 %v287_v54  ;;  %1061 = vmatprep.subr.mxu0 %v1336_v15 }
  0x43   :  { %1048 = vmatpush3.msra.mxu1 %v287_v54  ;;  %1062 = vmatpush3.msra.mxu0 %v1336_v15  ;;  %v1543_v15 = vand.u32 4294901760, %v46_v50 }
  0x44   :  { %1049 = vmatprep.subr.mxu1 %v294_v63  ;;  %1063 = vmatprep.subr.mxu0 %v1341_v17 }
  0x45   :  { %1050 = vmatpush3.msra.mxu1 %v294_v63  ;;  %1064 = vmatpush3.msra.mxu0 %v1341_v17  ;;  %v1552_v17 = vsub.f32 %v45_v2, %v1539_v14 }
  0x46   :  { %1051 = vmatprep.subr.mxu1 %v301_v0  ;;  %1065 = vmatprep.subr.mxu0 %v1345_v19 }
  0x47   :  { %1052 = vmatpush3.msra.mxu1 %v301_v0  ;;  %1053 = vmatprep.mubr.f32.mxu1 %v1432_v61 }
  0x48   :  { %1066 = vmatpush3.msra.mxu0 %v1345_v19  ;;  %1054 = vmatmul.mubr.f32.vlgmr.msra.gmra.mxu1 %v1435_v62  ;;  %v1557_v19 = vsub.f32 %v46_v50, %v1543_v15 }
  0x49   :  { %1067 = vmatprep.subr.mxu0 %v1348_v20  ;;  %1097 = vmatprep.subr.mxu1 %v1319_v3 }
  0x4a   :  { %1068 = vmatpush3.msra.mxu0 %v1348_v20  ;;  %1098 = vmatpush3.msra.mxu1 %v1319_v3  ;;  %v173_v20 = vand.u32 4294901760, %v1552_v17 }
  0x4b   :  { %1069 = vmatprep.subr.mxu0 %v1372_v29  ;;  %1099 = vmatprep.subr.mxu1 %v1321_v4 }
  0x4c   :  { %1070 = vmatpush3.msra.mxu0 %v1372_v29  ;;  %1100 = vmatpush3.msra.mxu1 %v1321_v4  ;;  %v183_v29 = vand.u32 4294901760, %v1557_v19 }
  0x4d   :  { %1071 = vmatprep.subr.mxu0 %v1382_v33  ;;  %1101 = vmatprep.subr.mxu1 %v1323_v5 }
  0x4e   :  { %1072 = vmatpush3.msra.mxu0 %v1382_v33  ;;  %1102 = vmatpush3.msra.mxu1 %v1323_v5  ;;  %v174_v33 = vsub.f32 %v1552_v17, %v173_v20 }
  0x4f   :  { %1073 = vmatprep.subr.mxu0 %v1400_v43  ;;  %1103 = vmatprep.subr.mxu1 %v1325_v9 }
  0x50   :  { %1074 = vmatpush3.msra.mxu0 %v1400_v43  ;;  %1104 = vmatpush3.msra.mxu1 %v1325_v9  ;;  %v184_v43 = vsub.f32 %v1557_v19, %v183_v29 }
  0x51   :  { %1075 = vmatprep.subr.mxu0 %v1406_v46  ;;  %1105 = vmatprep.subr.mxu1 %v1327_v10 }
  0x52   :  { %1076 = vmatpush3.msra.mxu0 %v1406_v46  ;;  %1106 = vmatpush3.msra.mxu1 %v1327_v10  ;;  %v175_v46 = vand.u32 4294901760, %v174_v33 }
  0x53   :  { %1077 = vmatprep.subr.mxu0 %v1418_v53  ;;  %1107 = vmatprep.subr.mxu1 %v1329_v11 }
  0x54   :  { %1078 = vmatpush3.msra.mxu0 %v1418_v53  ;;  %1108 = vmatpush3.msra.mxu1 %v1329_v11  ;;  %v185_v53 = vand.u32 4294901760, %v184_v43 }
  0x55   :  { %1079 = vmatprep.subr.mxu0 %v1430_v60  ;;  %1109 = vmatprep.subr.mxu1 %v1338_v16 }
  0x56   :  { %1080 = vmatpush3.msra.mxu0 %v1430_v60  ;;  %1110 = vmatpush3.msra.mxu1 %v1338_v16 }
  0x57   :  { %1081 = vmatprep.subr.mxu0 %v1444_v6  ;;  %1111 = vmatprep.subr.mxu1 %v1360_v24 }
  0x58   :  { %1082 = vmatpush3.msra.mxu0 %v1444_v6  ;;  %1112 = vmatpush3.msra.mxu1 %v1360_v24 }
  0x59   :  { %1083 = vmatprep.subr.mxu0 %v1459_v30  ;;  %1113 = vmatprep.subr.mxu1 %v1366_v27 }
  0x5a   :  { %1084 = vmatpush3.msra.mxu0 %v1459_v30  ;;  %1114 = vmatpush3.msra.mxu1 %v1366_v27 }
  0x5b   :  { %1085 = vmatprep.subr.mxu0 %v1477_v40  ;;  %1115 = vmatprep.subr.mxu1 %v1385_v34 }
  0x5c   :  { %1018 = vmatprep.mubr.f32.mxu0 %v175_v46  ;;  %1086 = vmatpush3.msra.mxu0 %v1477_v40 }
  0x5d   :  { %1116 = vmatpush3.msra.mxu1 %v1385_v34  ;;  %1019 = vmatmul.mubr.f32.gmra.mxu0 %v185_v53 }
  0x5e   :  { %1087 = vmatprep.subr.mxu0 %v1489_v51  ;;  %1117 = vmatprep.subr.mxu1 %v1403_v45 }
  0x5f   :  { %1088 = vmatpush3.msra.mxu0 %v1489_v51  ;;  %1118 = vmatpush3.msra.mxu1 %v1403_v45 }
  0x60   :  { %1089 = vmatprep.subr.mxu0 %v1499_v59  ;;  %1119 = vmatprep.subr.mxu1 %v1409_v47 }
  0x61   :  { %1090 = vmatpush3.msra.mxu0 %v1499_v59  ;;  %1091 = vmatprep.mubr.f32.mxu0 %v1456_v25 }
  0x62   :  { %1120 = vmatpush3.msra.mxu1 %v1409_v47  ;;  %1092 = vmatmul.mubr.f32.vlgmr.msra.gmra.mxu0 %v1465_v32 }
  0x63   :  { %1121 = vmatprep.subr.mxu1 %v1424_v57  ;;  %1135 = vmatprep.subr.mxu0 %v1352_v21 }
  0x64   :  { %1122 = vmatpush3.msra.mxu1 %v1424_v57  ;;  %1136 = vmatpush3.msra.mxu0 %v1352_v21  ;;  %v1714_v21 = vand.u32 4294901760, %v1456_v25 }
  0x65   :  { %1056 = vmatprep.mubr.f32.mxu1 %v1539_v14  ;;  %1123 = vmatprep.subr.mxu1 %v1447_v8 }
  0x66   :  { %1137 = vmatprep.subr.mxu0 %v1355_v22  ;;  %1057 = vmatmul.mubr.f32.gmra.mxu1 %v1543_v15 }
  0x67   :  { %1124 = vmatpush3.msra.mxu1 %v1447_v8  ;;  %1138 = vmatpush3.msra.mxu0 %v1355_v22  ;;  %v1715_v22 = vand.u32 4294901760, %v1465_v32 }
  0x68   :  { %1094 = vmatprep.mubr.f32.mxu0 %v1552_v17  ;;  %1125 = vmatprep.subr.mxu1 %v1462_v31 }
  0x69   :  { %1139 = vmatprep.subr.mxu0 %v1358_v23  ;;  %1095 = vmatmul.mubr.f32.gmra.mxu0 %v1557_v19 }
  0x6a   :  { %1126 = vmatpush3.msra.mxu1 %v1462_v31  ;;  %1140 = vmatpush3.msra.mxu0 %v1358_v23 }
  0x6b   :  { %1127 = vmatprep.subr.mxu1 %v1474_v38  ;;  %1141 = vmatprep.subr.mxu0 %v1364_v26 }
  0x6c   :  { %1128 = vmatpush3.msra.mxu1 %v1474_v38  ;;  %1129 = vmatprep.mubr.f32.mxu1 %v1714_v21 }
  0x6d   :  { %1142 = vmatpush3.msra.mxu0 %v1364_v26  ;;  %1130 = vmatmul.mubr.f32.vlgmr.msra.gmra.mxu1 %v1715_v22 }
  0x6e   :  { %1143 = vmatprep.subr.mxu0 %v1369_v28  ;;  %1173 = vmatprep.subr.mxu1 %v1319_v3 }
  0x6f   :  { %1144 = vmatpush3.msra.mxu0 %v1369_v28  ;;  %1174 = vmatpush3.msra.mxu1 %v1319_v3  ;;  %v862_v28 = vld [vmem:[%s1710_s2] ss:$0 sm:$0xff]  ;;  %s1286_s2 = smov [#allocation7]  }
  0x70   :  { %1145 = vmatprep.subr.mxu0 %v1391_v39  ;;  %1175 = vmatprep.subr.mxu1 %v1321_v4  ;;  %s849_s24 = sshll.u32 %s1286_s2, 4  ;;  %s850_s24 = int_to_ptr.vmem [resolvable:$true] %s849_s24 }
  0x71   :  { %1132 = vmatprep.mubr.f32.mxu1 %v173_v20  ;;  %1146 = vmatpush3.msra.mxu0 %v1391_v39  ;;  %s1256_s25 = scalar_lea.vmem %s850_s24, 512  ;;  %p1261_p11 = scmp.lt.s32.totalorder %s850_s24, %s850_s24 }
  0x72   :  { %1176 = vmatpush3.msra.mxu1 %v1321_v4  ;;  %1147 = vmatprep.subr.mxu0 %v1397_v42  ;;  %p1257_p10 = scmp.ne.s32.totalorder %s850_s24, %s1256_s25  ;;  %p1262_p12 = scmp.lt.s32.totalorder %s1256_s25, %s1256_s25 }
  0x73   :  { %1133 = vmatmul.mubr.f32.gmra.mxu1 %v183_v29  ;;  %1177 = vmatprep.subr.mxu1 %v1323_v5 }
  0x74   :  { %1148 = vmatpush3.msra.mxu0 %v1397_v42  ;;  %1178 = vmatpush3.msra.mxu1 %v1323_v5  ;;  %p1263_p13 = por %p1262_p12, %p1261_p11 }
  0x75   :  { %1149 = vmatprep.subr.mxu0 %v1415_v52  ;;  %1179 = vmatprep.subr.mxu1 %v1325_v9 }
  0x76   :  { %1150 = vmatpush3.msra.mxu0 %v1415_v52  ;;  %1180 = vmatpush3.msra.mxu1 %v1325_v9  ;;  %p1264_p0 = pnand %p1263_p13, %p1257_p10 }
  0x77   :  { %1151 = vmatprep.subr.mxu0 %v1427_v58  ;;  %1181 = vmatprep.subr.mxu1 %v1327_v10 }
  0x78   :  { %1152 = vmatpush3.msra.mxu0 %v1427_v58  ;;  %1182 = vmatpush3.msra.mxu1 %v1327_v10 }
  0x79   :  { %1153 = vmatprep.subr.mxu0 %v1441_v1  ;;  %1183 = vmatprep.subr.mxu1 %v1329_v11 }
  0x7a   :  { %1154 = vmatpush3.msra.mxu0 %v1441_v1  ;;  %1184 = vmatpush3.msra.mxu1 %v1329_v11 }
  0x7b   :  { %1155 = vmatprep.subr.mxu0 %v1453_v13  ;;  %1185 = vmatprep.subr.mxu1 %v1338_v16 }
  0x7c   :  { %1156 = vmatpush3.msra.mxu0 %v1453_v13  ;;  %1186 = vmatpush3.msra.mxu1 %v1338_v16 }
  0x7d   :  { %1157 = vmatprep.subr.mxu0 %v1471_v37  ;;  %1187 = vmatprep.subr.mxu1 %v1360_v24 }
  0x7e   :  { %1158 = vmatpush3.msra.mxu0 %v1471_v37  ;;  %1188 = vmatpush3.msra.mxu1 %v1360_v24 }
  0x7f   :  { %1159 = vmatprep.subr.mxu0 %v1484_v49  ;;  %1189 = vmatprep.subr.mxu1 %v1366_v27 }
  0x80   :  { %1160 = vmatpush3.msra.mxu0 %v1484_v49  ;;  %1190 = vmatpush3.msra.mxu1 %v1366_v27 }
  0x81   :  { %1161 = vmatprep.subr.mxu0 %v1496_v56  ;;  %1191 = vmatprep.subr.mxu1 %v1385_v34 }
  0x82   :  { %1162 = vmatpush3.msra.mxu0 %v1496_v56  ;;  %1192 = vmatpush3.msra.mxu1 %v1385_v34 }
  0x83   :  { %1163 = vmatprep.subr.mxu0 %v1512_v12  ;;  %1193 = vmatprep.subr.mxu1 %v1403_v45 }
  0x84   :  { %1164 = vmatpush3.msra.mxu0 %v1512_v12  ;;  %1194 = vmatpush3.msra.mxu1 %v1403_v45 }
  0x85   :  { %1165 = vmatprep.subr.mxu0 %v1519_v36  ;;  %1195 = vmatprep.subr.mxu1 %v1409_v47 }
  0x86   :  { %1166 = vmatpush3.msra.mxu0 %v1519_v36  ;;  %1167 = vmatprep.mubr.f32.mxu0 %v1432_v61 }
  0x87   :  { %1196 = vmatpush3.msra.mxu1 %v1409_v47  ;;  %1168 = vmatmul.mubr.f32.vlgmr.msra.gmra.mxu0 %v1435_v62 }
  0x88   :  { %1197 = vmatprep.subr.mxu1 %v1424_v57  ;;  %1170 = vmatprep.mubr.f32.mxu0 %v1539_v14 }
  0x89   :  { %1198 = vmatpush3.msra.mxu1 %v1424_v57  ;;  %1205 = vmatprep.mubr.f32.mxu1 %v1432_v61 }
  0x8a   :  { %1199 = vmatprep.subr.mxu1 %v1447_v8 }
  0x8b   :  { %1200 = vmatpush3.msra.mxu1 %v1447_v8  ;;  %1171 = vmatmul.mubr.f32.gmra.mxu0 %v1543_v15 }
  0x8c   :  { %1201 = vmatprep.subr.mxu1 %v1462_v31 }
  0x8d   :  { %1202 = vmatpush3.msra.mxu1 %v1462_v31 }
  0x8e   :  { %1203 = vmatprep.subr.mxu1 %v1474_v38 }
  0x8f   :  { %1204 = vmatpush3.msra.mxu1 %v1474_v38 }
  0x90   :  { %1206 = vmatmul.mubr.f32.vlgmr.msra.gmra.mxu1 %v1435_v62 }
  0x91   :  { %1208 = vmatprep.mubr.f32.mxu1 %v1539_v14 }
  0x94   :  { %1209 = vmatmul.mubr.f32.gmra.mxu1 %v1543_v15 }
 0x100   :  { %v1017_v3 = vpop.f32.mrf.mxu0 }
 0x101   :  { %v168_v39 = vadd.f32 %v1017_v3, %v862_v28 }
 0x102   :  { %v157_v4 = vpop.f32.mrf.mxu0 }
 0x103   :  { %v158_v47 = vadd.f32 %v862_v28, %v157_v4 }
 0x108   :  { %v1055_v9 = vpop.f32.mrf.mxu1 }
 0x109   :  { %v345_v58 = vadd.f32 %v1055_v9, %v168_v39 }
 0x10a   :  { %v338_v11 = vpop.f32.mrf.mxu1 }
 0x10b   :  { %v339_v1 = vadd.f32 %v338_v11, %v158_v47 }
 0x11d   :  { %v1020_v5 = vpop.f32.mrf.mxu0 }
 0x11e   :  { %v188_v52 = vadd.f32 %v1020_v5, %v862_v28 }
 0x11f   :  { %v177_v10 = vpop.f32.mrf.mxu0 }
 0x120   :  { %v178_v60 = vadd.f32 %v862_v28, %v177_v10 }
 0x122   :  { %v1093_v16 = vpop.f32.mrf.mxu0 }
 0x123   :  { %v468_v6 = vadd.f32 %v1093_v16, %v345_v58 }
 0x124   :  { %v460_v24 = vpop.f32.mrf.mxu0 }
 0x125   :  { %v461_v13 = vadd.f32 %v460_v24, %v339_v1 }
 0x126   :  { %v1058_v23 = vpop.f32.mrf.mxu1 }
 0x127   :  { %v357_v8 = vadd.f32 %v1058_v23, %v188_v52 }
 0x128   :  { %v350_v26 = vpop.f32.mrf.mxu1 }
 0x129   :  { %v1096_v27 = vpop.f32.mrf.mxu0  ;;  %v351_v25 = vadd.f32 %v350_v26, %v178_v60 }
 0x12a   :  { %v482_v37 = vadd.f32 %v1096_v27, %v357_v8 }
 0x12b   :  { %v474_v42 = vpop.f32.mrf.mxu0 }
 0x12c   :  { %v475_v49 = vadd.f32 %v474_v42, %v351_v25 }
 0x12d   :  { %v1131_v34 = vpop.f32.mrf.mxu1 }
 0x12e   :  { %v579_v30 = vadd.f32 %v1131_v34, %v468_v6 }
 0x12f   :  { %v570_v45 = vpop.f32.mrf.mxu1 }
 0x130   :  { %v571_v38 = vadd.f32 %v570_v45, %v461_v13 }
 0x133   :  { %v1134_v61 = vpop.f32.mrf.mxu1 }
 0x134   :  { %v595_v51 = vadd.f32 %v1134_v61, %v482_v37 }
 0x135   :  { %v586_v31 = vpop.f32.mrf.mxu1 }
 0x136   :  { %v587_v18 = vadd.f32 %v586_v31, %v475_v49 }
 0x147   :  { %v1169_v57 = vpop.f32.mrf.mxu0 }
 0x148   :  { %v720_v40 = vadd.f32 %v1169_v57, %v579_v30 }
 0x149   :  { %v713_v62 = vpop.f32.mrf.mxu0 }
 0x14a   :  { %v714_v56 = vadd.f32 %v713_v62, %v571_v38 }
 0x14b   :  { %v1172_v32 = vpop.f32.mrf.mxu0 }
 0x14c   :  { %v732_v35 = vadd.f32 %v1172_v32, %v595_v51 }
 0x14d   :  { %v725_v7 = vpop.f32.mrf.mxu0 }
 0x14e   :  { %v726_v44 = vadd.f32 %v725_v7, %v587_v18 }
 0x150   :  { %v1207_v48 = vpop.f32.mrf.mxu1 }
 0x151   :  { %v825_v59 = vadd.f32 %v1207_v48, %v720_v40 }
 0x152   :  { %v818_v12 = vpop.f32.mrf.mxu1 }
 0x153   :  { %841 = vst [vmem:[#allocation7 + $0x8] sm:$0xff] %v825_v59  ;;  %v819_v36 = vadd.f32 %v818_v12, %v714_v56 }
 0x154   :  { %v1210_v41 = vpop.f32.mrf.mxu1 }
 0x155   :  { %840 = vst [vmem:[#allocation7] sm:$0xff] %v819_v36  ;;  %v837_v55 = vadd.f32 %v1210_v41, %v732_v35 }
 0x156   :  { %v830_v54 = vpop.f32.mrf.mxu1 }
 0x157   :  { %843 = vst [vmem:[#allocation7 + $0x18] sm:$0xff] %v837_v55  ;;  %v831_v63 = vadd.f32 %v830_v54, %v726_v44 }
 0x159   :  { %842 = vst [vmem:[#allocation7 + $0x10] sm:$0xff] %v831_v63 }
 0x15a   :  { %1267 = shalt.err (!%p1264_p0)
}
 0x15b   :  { %855 = dma.vmem_to_hbm [thread:$0]  %s850_s24, 512, %s1711_s3, [#allocation4], %s1283_s15, %s1283_s15, %s1284_s16  }
 0x15c   :  { %1280 = dma.done.wait [#allocation4], 512  }
 0x15d   :  { %1281 = vsyncadd [#allocation4], 4294966784 }
 0x15e   :  { %859 = vsyncpa [#allocation3], 1 }
 0x15f   :  { %860 = vsyncpa [#allocation6], 1 }
 0x160   :  { %861 = vsyncpa [#allocation4], 1 }

</bundles_post_ra>
